<compile_context>
chip_gen: v6e
topology: v6e:2x2x1
jax: 0.10.0
libtpu: 0.0.40
codegen_flags: <defaults>
</compile_context>

<pallas_src>
import math
import functools

import jax
import jax.numpy as jnp
from jax.experimental import pallas as pl
from jax.experimental.pallas import tpu as pltpu

_GELU_CONST = math.sqrt(2.0 / math.pi)

# v7x-safe working-set budget (64 MiB physical VMEM per TensorCore).
_VMEM_BUDGET = 44 * 1024 * 1024
_WEIGHT_H_CANDIDATES = (2048, 1536, 1280, 1024, 768, 640, 512, 384, 256, 128)


def _new_gelu(x):
    # 0.5 * x * (1 + tanh(sqrt(2/pi) * (x + 0.044715 * x^3)))
    return 0.5 * x * (1.0 + jnp.tanh(_GELU_CONST * (x + 0.044715 * (x * x * x))))


def _round_up(x, m):
    return ((x + m - 1) // m) * m


def _working_set_bytes(block_m, block_h, E, x_bytes, w_bytes, out_bytes, use_acc):
    """Rough double-buffered VMEM working-set estimate for one grid step."""
    weights = 2 * (E * block_h + block_h * E) * w_bytes           # Wfc + Wproj chunks
    acts = 2 * block_m * E * x_bytes + 2 * block_m * E * out_bytes
    acc = block_m * E * 4 if use_acc else 0
    bias = 2 * (8 * _round_up(block_h, 128) + 8 * _round_up(E, 128)) * w_bytes
    return weights + acts + acc + bias


def _select_tiles(M, E, H, x_bytes, w_bytes, out_bytes, use_acc,
                  block_m=None, block_h=None, budget=_VMEM_BUDGET):
    # M tile: big enough to amortize weight streaming / feed the 256-wide MXU.
    req_m = 512 if block_m is None else block_m
    req_m = max(8, _round_up(min(req_m, _round_up(M, 8)), 8))

    if block_h is not None:
        if block_h != H and (H % block_h != 0 or block_h % 128 != 0):
            raise ValueError("block_h must equal H or be a multiple of 128 dividing H")
        return req_m, block_h

    # H tile: prefer full residency (block_h == H -> weights DMA'd once), else
    # the largest lane-dense chunk that divides H and fits the VMEM budget.
    h_candidates = [H] + [c for c in _WEIGHT_H_CANDIDATES if c < H and H % c == 0]
    for bm in (req_m, 256, 128, 64, 32, 16, 8):
        if bm > req_m:
            continue
        for bh in h_candidates:
            if _working_set_bytes(bm, bh, E, x_bytes, w_bytes, out_bytes,
                                  use_acc) <= budget:
                return bm, bh
    # Last resort: smallest streaming chunk (vmem_limit is raised accordingly).
    return min(req_m, 128), h_candidates[-1]


def _fc_gelu_proj_partial(x_ref, wfc_ref, bfc_ref, wproj_ref, gelu_dtype):
    """One (block_m, block_h) step: gelu(x @ Wfc_chunk + bfc_chunk) @ Wproj_chunk."""
    a = x_ref[...]
    if a.dtype != wfc_ref.dtype:
        # bf16 weights -> cast the activation tile so the bf16 MXU path is used.
        a = a.astype(wfc_ref.dtype)
    h = jnp.dot(a, wfc_ref[...], preferred_element_type=jnp.float32)
    h = h + bfc_ref[...].astype(jnp.float32)
    # NewGELU; bf16 on v6e/v7x-style bf16 pipelines, tanh goes to the EUP slot.
    h = _new_gelu(h.astype(gelu_dtype))
    return jnp.dot(h.astype(wproj_ref.dtype), wproj_ref[...],
                   preferred_element_type=jnp.float32)


def _mlp_kernel_f32out(x_ref, wfc_ref, bfc_ref, wproj_ref, bproj_ref, o_ref, *,
                       gelu_dtype):
    # Output dtype is f32: accumulate directly into the resident output block
    # (no separate f32 scratch -> saves block_m*E*4 bytes of VMEM, v7x headroom).
    k = pl.program_id(1)

    @pl.when(k == 0)
    def _():
        o_ref[...] = jnp.zeros_like(o_ref)

    o_ref[...] += _fc_gelu_proj_partial(x_ref, wfc_ref, bfc_ref, wproj_ref,
                                        gelu_dtype)

    @pl.when(k == pl.num_programs(1) - 1)
    def _():
        o_ref[...] += bproj_ref[...].astype(jnp.float32)


def _mlp_kernel_acc(x_ref, wfc_ref, bfc_ref, wproj_ref, bproj_ref, o_ref,
                    acc_ref, *, gelu_dtype):
    # Non-f32 output (e.g. bf16): keep an f32 VMEM accumulator across the H axis.
    k = pl.program_id(1)

    @pl.when(k == 0)
    def _():
        acc_ref[...] = jnp.zeros_like(acc_ref)

    acc_ref[...] += _fc_gelu_proj_partial(x_ref, wfc_ref, bfc_ref, wproj_ref,
                                          gelu_dtype)

    @pl.when(k == pl.num_programs(1) - 1)
    def _():
        o_ref[...] = (acc_ref[...]
                      + bproj_ref[...].astype(jnp.float32)).astype(o_ref.dtype)


@functools.partial(jax.jit,
                   static_argnames=("block_m", "block_h", "cast_weights_to_bf16"))
def gpt2_mlp(x, w_fc, b_fc, w_proj, b_proj, *, block_m=None, block_h=None,
             cast_weights_to_bf16=False):
    """x: [B, T, E]; w_fc: [E, 4E]; b_fc: [4E]; w_proj: [4E, E]; b_proj: [E]."""
    B, T, E = x.shape
    H = w_fc.shape[1]
    M = B * T

    if cast_weights_to_bf16:
        # Halves weight HBM/VMEM bytes and unlocks the bf16 MXU on v6e/v7x;
        # f32 accumulation inside the kernel preserves accuracy.
        w_fc = w_fc.astype(jnp.bfloat16)
        w_proj = w_proj.astype(jnp.bfloat16)

    out_dtype = x.dtype
    use_acc = out_dtype != jnp.float32
    # bf16 GELU only when the weights are already bf16 (v6e/v7x path); keep f32
    # otherwise (and for v5e-style full-precision pipelines).
    gelu_dtype = jnp.bfloat16 if w_fc.dtype == jnp.bfloat16 else jnp.float32

    block_m, block_h = _select_tiles(
        M, E, H,
        x_bytes=x.dtype.itemsize,
        w_bytes=w_fc.dtype.itemsize,
        out_bytes=jnp.dtype(out_dtype).itemsize,
        use_acc=use_acc,
        block_m=block_m, block_h=block_h)

    grid_m = pl.cdiv(M, block_m)          # no jnp.pad: trailing block is masked
    grid_h = H // block_h                 # block_h divides H (or equals it)
    grid = (grid_m, grid_h)

    ws = _working_set_bytes(block_m, block_h, E, x.dtype.itemsize,
                            w_fc.dtype.itemsize, jnp.dtype(out_dtype).itemsize,
                            use_acc)
    vmem_limit = int(min(96 << 20, max(32 << 20, ws + (ws >> 2) + (4 << 20))))

    x2 = x.reshape(M, E)
    b_fc2 = b_fc.reshape(1, H)
    b_proj2 = b_proj.reshape(1, E)

    if use_acc:
        kernel = functools.partial(_mlp_kernel_acc, gelu_dtype=gelu_dtype)
        scratch_shapes = [pltpu.VMEM((block_m, E), jnp.float32)]
    else:
        kernel = functools.partial(_mlp_kernel_f32out, gelu_dtype=gelu_dtype)
        scratch_shapes = []

    out2 = pl.pallas_call(
        kernel,
        out_shape=jax.ShapeDtypeStruct((M, E), out_dtype),
        grid=grid,
        in_specs=[
            pl.BlockSpec((block_m, E), lambda i, k: (i, 0)),   # x row tile
            pl.BlockSpec((E, block_h), lambda i, k: (0, k)),   # W_fc H-chunk
            pl.BlockSpec((1, block_h), lambda i, k: (0, k)),   # b_fc H-chunk
            pl.BlockSpec((block_h, E), lambda i, k: (k, 0)),   # W_proj H-chunk
            pl.BlockSpec((1, E), lambda i, k: (0, 0)),         # b_proj
        ],
        out_specs=pl.BlockSpec((block_m, E), lambda i, k: (i, 0)),
        scratch_shapes=scratch_shapes,
        compiler_params=pltpu.CompilerParams(
            dimension_semantics=("parallel", "arbitrary"),
            vmem_limit_bytes=vmem_limit),
    )(x2, w_fc, b_fc2, w_proj, b_proj2)

    return out2.reshape(B, T, E)


def _reference_mlp(x, w_fc, b_fc, w_proj, b_proj):
    h = jnp.einsum("bte,eh->bth", x, w_fc) + b_fc
    h = _new_gelu(h)
    return jnp.einsum("bth,he->bte", h, w_proj) + b_proj


if __name__ == "__main__":
    B, T, E = 2, 8, 32          # small shapes consistent with the module
    H = 4 * E

    key = jax.random.PRNGKey(0)
    kx, kwfc, kbfc, kwp, kbp = jax.random.split(key, 5)

    x = jax.random.normal(kx, (B, T, E), dtype=jnp.float32)
    # deterministic synthetic parameters (nn.Linear-like scale)
    w_fc = jax.random.normal(kwfc, (E, H), dtype=jnp.float32) / math.sqrt(E)
    b_fc = jax.random.normal(kbfc, (H,), dtype=jnp.float32) * 0.02
    w_proj = jax.random.normal(kwp, (H, E), dtype=jnp.float32) / math.sqrt(H)
    b_proj = jax.random.normal(kbp, (E,), dtype=jnp.float32) * 0.02

    out = gpt2_mlp(x, w_fc, b_fc, w_proj, b_proj)
    jax.block_until_ready(out)

    ref = _reference_mlp(x, w_fc, b_fc, w_proj, b_proj)
    assert out.shape == (B, T, E)
    assert jnp.allclose(out, ref, atol=1e-4, rtol=1e-4), "mismatch vs reference"

    print("KERNEL_OK")
</pallas_src>

<mosaic_0001>
module attributes {stable_mosaic.version = 11 : i64} {
  func.func @_mlp_kernel_f32out(%arg0: i32, %arg1: i32, %arg2: memref<16x32xf32, #tpu.memory_space<vmem>>, %arg3: memref<32x128xf32, #tpu.memory_space<vmem>>, %arg4: memref<1x128xf32, #tpu.memory_space<vmem>>, %arg5: memref<128x32xf32, #tpu.memory_space<vmem>>, %arg6: memref<1x32xf32, #tpu.memory_space<vmem>>, %arg7: memref<16x32xf32, #tpu.memory_space<vmem>>) attributes {dimension_semantics = [#tpu.dimension_semantics<parallel>, #tpu.dimension_semantics<arbitrary>], iteration_bounds = array<i64: 1, 1>, scalar_prefetch = 0 : i64, scratch_operands = 0 : i64, tpu.core_type = #tpu.core_type<tc>, window_params = [{transform_indices = @transform_0, window_bounds = array<i64: 16, 32>}, {transform_indices = @transform_1, window_bounds = array<i64: 32, 128>}, {transform_indices = @transform_2, window_bounds = array<i64: 1, 128>}, {transform_indices = @transform_3, window_bounds = array<i64: 128, 32>}, {pipeline_mode = #tpu.pipeline_mode<synchronous>, transform_indices = @transform_4, window_bounds = array<i64: 1, 32>}, {transform_indices = @transform_5, window_bounds = array<i64: 16, 32>}]} {
    %c0_i32 = arith.constant 0 : i32
    %0 = arith.cmpi eq, %arg1, %c0_i32 : i32
    %1 = arith.extui %0 : i1 to i32
    %c0_i32_0 = arith.constant 0 : i32
    %2 = arith.cmpi ne, %1, %c0_i32_0 : i32
    scf.if %2 {
      %cst_19 = arith.constant 0.000000e+00 : f32
      %30 = vector.broadcast %cst_19 : f32 to vector<16x32xf32>
      %c0_20 = arith.constant 0 : index
      %c0_21 = arith.constant 0 : index
      %31 = vector.load %arg7[%c0_20, %c0_21] : memref<16x32xf32, #tpu.memory_space<vmem>>, vector<16x32xf32>
      tpu.vector_store %arg7[%c0_20, %c0_21], %30 {strides = array<i32>} : memref<16x32xf32, #tpu.memory_space<vmem>>, vector<16x32xf32>,
    } else {
    }
    %c0 = arith.constant 0 : index
    %c0_1 = arith.constant 0 : index
    %3 = vector.load %arg7[%c0, %c0_1] : memref<16x32xf32, #tpu.memory_space<vmem>>, vector<16x32xf32>
    %c0_2 = arith.constant 0 : index
    %c0_3 = arith.constant 0 : index
    %4 = vector.load %arg2[%c0_2, %c0_3] : memref<16x32xf32, #tpu.memory_space<vmem>>, vector<16x32xf32>
    %c0_4 = arith.constant 0 : index
    %c0_5 = arith.constant 0 : index
    %5 = vector.load %arg3[%c0_4, %c0_5] : memref<32x128xf32, #tpu.memory_space<vmem>>, vector<32x128xf32>
    %cst = arith.constant dense<0.000000e+00> : vector<16x128xf32>
    %6 = tpu.matmul %4, %5, %cst {dimension_numbers = #tpu.dot_dimension_numbers<[1], [0], [0], [1], [0, 0, 1, 1], [], []>} : vector<16x32xf32>, vector<32x128xf32>, vector<16x128xf32> -> vector<16x128xf32>
    %c0_6 = arith.constant 0 : index
    %c0_7 = arith.constant 0 : index
    %7 = vector.load %arg4[%c0_6, %c0_7] : memref<1x128xf32, #tpu.memory_space<vmem>>, vector<1x128xf32>
    %8 = vector.broadcast %7 : vector<1x128xf32> to vector<16x128xf32>
    %9 = arith.addf %6, %8 : vector<16x128xf32>
    %cst_8 = arith.constant 5.000000e-01 : f32
    %10 = vector.broadcast %cst_8 : f32 to vector<16x128xf32>
    %11 = arith.mulf %10, %9 : vector<16x128xf32>
    %12 = arith.mulf %9, %9 : vector<16x128xf32>
    %13 = arith.mulf %12, %9 : vector<16x128xf32>
    %cst_9 = arith.constant 4.471500e-02 : f32
    %14 = vector.broadcast %cst_9 : f32 to vector<16x128xf32>
    %15 = arith.mulf %14, %13 : vector<16x128xf32>
    %16 = arith.addf %9, %15 : vector<16x128xf32>
    %cst_10 = arith.constant 0.797884583 : f32
    %17 = vector.broadcast %cst_10 : f32 to vector<16x128xf32>
    %18 = arith.mulf %17, %16 : vector<16x128xf32>
    %19 = math.tanh %18 : vector<16x128xf32>
    %cst_11 = arith.constant 1.000000e+00 : f32
    %20 = vector.broadcast %cst_11 : f32 to vector<16x128xf32>
    %21 = arith.addf %20, %19 : vector<16x128xf32>
    %22 = arith.mulf %11, %21 : vector<16x128xf32>
    %c0_12 = arith.constant 0 : index
    %c0_13 = arith.constant 0 : index
    %23 = vector.load %arg5[%c0_12, %c0_13] : memref<128x32xf32, #tpu.memory_space<vmem>>, vector<128x32xf32>
    %cst_14 = arith.constant dense<0.000000e+00> : vector<16x32xf32>
    %24 = tpu.matmul %22, %23, %cst_14 {dimension_numbers = #tpu.dot_dimension_numbers<[1], [0], [0], [1], [0, 0, 1, 1], [], []>} : vector<16x128xf32>, vector<128x32xf32>, vector<16x32xf32> -> vector<16x32xf32>
    %25 = arith.addf %3, %24 : vector<16x32xf32>
    %c0_15 = arith.constant 0 : index
    %c0_16 = arith.constant 0 : index
    %26 = vector.load %arg7[%c0_15, %c0_16] : memref<16x32xf32, #tpu.memory_space<vmem>>, vector<16x32xf32>
    tpu.vector_store %arg7[%c0_15, %c0_16], %25 {strides = array<i32>} : memref<16x32xf32, #tpu.memory_space<vmem>>, vector<16x32xf32>,
    %c0_i32_17 = arith.constant 0 : i32
    %27 = arith.cmpi eq, %arg1, %c0_i32_17 : i32
    %28 = arith.extui %27 : i1 to i32
    %c0_i32_18 = arith.constant 0 : i32
    %29 = arith.cmpi ne, %28, %c0_i32_18 : i32
    scf.if %29 {
      %c0_19 = arith.constant 0 : index
      %c0_20 = arith.constant 0 : index
      %30 = vector.load %arg7[%c0_19, %c0_20] : memref<16x32xf32, #tpu.memory_space<vmem>>, vector<16x32xf32>
      %c0_21 = arith.constant 0 : index
      %c0_22 = arith.constant 0 : index
      %31 = vector.load %arg6[%c0_21, %c0_22] : memref<1x32xf32, #tpu.memory_space<vmem>>, vector<1x32xf32>
      %32 = vector.broadcast %31 : vector<1x32xf32> to vector<16x32xf32>
      %33 = arith.addf %30, %32 : vector<16x32xf32>
      %c0_23 = arith.constant 0 : index
      %c0_24 = arith.constant 0 : index
      %34 = vector.load %arg7[%c0_23, %c0_24] : memref<16x32xf32, #tpu.memory_space<vmem>>, vector<16x32xf32>
      tpu.vector_store %arg7[%c0_23, %c0_24], %33 {strides = array<i32>} : memref<16x32xf32, #tpu.memory_space<vmem>>, vector<16x32xf32>,
    } else {
    }
    return
  }
  func.func @transform_0(%arg0: i32, %arg1: i32) -> (i32, i32) {
    %c0_i32 = arith.constant 0 : i32
    %c0_i32_0 = arith.constant 0 : i32
    return %arg0, %c0_i32 : i32, i32
  }
  func.func @transform_1(%arg0: i32, %arg1: i32) -> (i32, i32) {
    %c0_i32 = arith.constant 0 : i32
    %c0_i32_0 = arith.constant 0 : i32
    return %c0_i32, %arg1 : i32, i32
  }
  func.func @transform_2(%arg0: i32, %arg1: i32) -> (i32, i32) {
    %c0_i32 = arith.constant 0 : i32
    %c0_i32_0 = arith.constant 0 : i32
    return %c0_i32, %arg1 : i32, i32
  }
  func.func @transform_3(%arg0: i32, %arg1: i32) -> (i32, i32) {
    %c0_i32 = arith.constant 0 : i32
    %c0_i32_0 = arith.constant 0 : i32
    return %arg1, %c0_i32 : i32, i32
  }
  func.func @transform_4(%arg0: i32, %arg1: i32) -> (i32, i32) {
    %c0_i32 = arith.constant 0 : i32
    %c0_i32_0 = arith.constant 0 : i32
    %c0_i32_1 = arith.constant 0 : i32
    return %c0_i32, %c0_i32_0 : i32, i32
  }
  func.func @transform_5(%arg0: i32, %arg1: i32) -> (i32, i32) {
    %c0_i32 = arith.constant 0 : i32
    %c0_i32_0 = arith.constant 0 : i32
    return %arg0, %c0_i32 : i32, i32
  }
}

</mosaic_0001>

<bundles_post_ra>
// kernel: gpt2_mlp.1
= control target key start
LH: loop header
LB: loop body
LE: loop exit
PB: predicated region body
PF: predicated region fallthrough
CT: control target
= control target key end

     0   :  { %vm25_vm0 = vcmask 261120   ;;  %s491_s0 = inlined_call_operand.vmem [shape: f32[16,32], index: 0, kind: input, shape index: {}]   ;;  %s492_s1 = inlined_call_operand.vmem [shape: f32[32,128], index: 1, kind: input, shape index: {}]   ;;  %s493_s2 = inlined_call_operand.vmem [shape: f32[1,128], index: 2, kind: input, shape index: {}]   ;;  %s494_s3 = inlined_call_operand.vmem [shape: f32[128,32], index: 3, kind: input, shape index: {}]   ;;  %s495_s4 = inlined_call_operand.vmem [shape: f32[1,32], index: 4, kind: input, shape index: {}]   ;;  %s496_s5 = inlined_call_operand.hbm [shape: f32[16,32], index: 5, kind: output, shape index: {}]  }
   0x1   :  { %v35_v0 = vld [vmem:[%s492_s1 + $0x18] sm:$0xff]  ;;  %v34_v1 = vld [vmem:[%s492_s1 + $0x10] sm:$0xff]  ;;  %v30_v2 = vld [vmem:[%s491_s0] sm:$0xff] }
   0x2   :  { %298 = vmatprep.subr.mxu0 %v35_v0  ;;  %v33_v3 = vld [vmem:[%s492_s1 + $0x8] sm:$0xff]  ;;  %306 = vmatprep.mubr.msk.f32.mxu0 %vm25_vm0, %v30_v2 }
   0x3   :  { %299 = vmatpush3.msra.mxu0 %v35_v0 }
   0x4   :  { %10 = vsyncpa [#allocation3], 0  ;;  %300 = vmatprep.subr.mxu0 %v34_v1  ;;  %v32_v4 = vld [vmem:[%s492_s1] sm:$0xff]  ;;  %v31_v5 = vld [vmem:[%s491_s0 + $0x8] sm:$0xff]  ;;  %v374_v22 = vmov 0.0   ;;  %s375_s10 = smov [#allocation2]  }
   0x5   :  { %301 = vmatpush3.msra.mxu0 %v34_v1  ;;  %v158_v6 = vld [vmem:[%s494_s3 + $0x78] sm:$0xff]  ;;  %v157_v7 = vld [vmem:[%s494_s3 + $0x70] sm:$0xff]  ;;  %v156_v8 = vld [vmem:[%s494_s3 + $0x68] sm:$0xff]  ;;  %27 = vst.msk [vmem:[#allocation2 + $0x8] sm:$0xff] %vm25_vm0, %v374_v22  ;;  %s259_s11 = sshll.u32 %s375_s10, 4  ;;  %s260_s11 = int_to_ptr.vmem [resolvable:$true] %s259_s11 }
   0x6   :  { %302 = vmatprep.subr.mxu0 %v33_v3  ;;  %309 = vmatprep.subr.mxu1 %v158_v6  ;;  %v155_v9 = vld [vmem:[%s494_s3 + $0x60] sm:$0xff]  ;;  %v154_v10 = vld [vmem:[%s494_s3 + $0x58] sm:$0xff]  ;;  %v153_v11 = vld [vmem:[%s494_s3 + $0x50] sm:$0xff]  ;;  %26 = vst.msk [vmem:[#allocation2] sm:$0xff] %vm25_vm0, %v374_v22  ;;  %s352_s12 = scalar_lea.vmem %s260_s11, 256  ;;  %p357_p1 = scmp.lt.s32.totalorder %s260_s11, %s260_s11 }
   0x7   :  { %303 = vmatpush3.msra.mxu0 %v33_v3  ;;  %310 = vmatpush3.msra.mxu1 %v158_v6  ;;  %v152_v12 = vld [vmem:[%s494_s3 + $0x48] sm:$0xff]  ;;  %v151_v13 = vld [vmem:[%s494_s3 + $0x40] sm:$0xff]  ;;  %v150_v14 = vld [vmem:[%s494_s3 + $0x38] sm:$0xff]  ;;  %p353_p0 = scmp.ne.s32.totalorder %s260_s11, %s352_s12  ;;  %p358_p2 = scmp.lt.s32.totalorder %s352_s12, %s352_s12 }
   0x8   :  { %304 = vmatprep.subr.mxu0 %v32_v4  ;;  %311 = vmatprep.subr.mxu1 %v157_v7  ;;  %v149_v15 = vld [vmem:[%s494_s3 + $0x30] sm:$0xff]  ;;  %v148_v16 = vld [vmem:[%s494_s3 + $0x28] sm:$0xff]  ;;  %v147_v17 = vld [vmem:[%s494_s3 + $0x20] sm:$0xff] }
   0x9   :  { %305 = vmatpush3.msra.mxu0 %v32_v4  ;;  %312 = vmatpush3.msra.mxu1 %v157_v7  ;;  %v146_v18 = vld [vmem:[%s494_s3 + $0x18] sm:$0xff]  ;;  %v145_v19 = vld [vmem:[%s494_s3 + $0x10] sm:$0xff]  ;;  %v144_v20 = vld [vmem:[%s494_s3 + $0x8] sm:$0xff]  ;;  %p359_p3 = por %p358_p2, %p357_p1 }
   0xa   :  { %307 = vmatmul.mubr.msk.f32.vlgmr.msra.gmra.mxu0 %vm25_vm0, %v31_v5  ;;  %313 = vmatprep.subr.mxu1 %v156_v8  ;;  %v143_v21 = vld [vmem:[%s494_s3] sm:$0xff] }
   0xb   :  { %314 = vmatpush3.msra.mxu1 %v156_v8  ;;  %v270_v23 = vld [vmem:[%s493_s2] ss:$0 sm:$0xff]  ;;  %p360_p4 = pnand %p359_p3, %p353_p0 }
   0xc   :  { %315 = vmatprep.subr.mxu1 %v155_v9  ;;  %v29_v46 = vld [vmem:[#allocation2 + $0x8] sm:$0xff]  ;;  %v273_v52 = vld [vmem:[%s495_s4] ss:$0 sm:$0xff] }
   0xd   :  { %316 = vmatpush3.msra.mxu1 %v155_v9  ;;  %v28_v48 = vld [vmem:[#allocation2] sm:$0xff] }
   0xe   :  { %317 = vmatprep.subr.mxu1 %v154_v10 }
   0xf   :  { %318 = vmatpush3.msra.mxu1 %v154_v10 }
  0x10   :  { %319 = vmatprep.subr.mxu1 %v153_v11 }
  0x11   :  { %320 = vmatpush3.msra.mxu1 %v153_v11 }
  0x12   :  { %321 = vmatprep.subr.mxu1 %v152_v12 }
  0x13   :  { %322 = vmatpush3.msra.mxu1 %v152_v12 }
  0x14   :  { %323 = vmatprep.subr.mxu1 %v151_v13 }
  0x15   :  { %324 = vmatpush3.msra.mxu1 %v151_v13 }
  0x16   :  { %325 = vmatprep.subr.mxu1 %v150_v14 }
  0x17   :  { %326 = vmatpush3.msra.mxu1 %v150_v14 }
  0x18   :  { %327 = vmatprep.subr.mxu1 %v149_v15 }
  0x19   :  { %328 = vmatpush3.msra.mxu1 %v149_v15 }
  0x1a   :  { %329 = vmatprep.subr.mxu1 %v148_v16 }
  0x1b   :  { %330 = vmatpush3.msra.mxu1 %v148_v16 }
  0x1c   :  { %331 = vmatprep.subr.mxu1 %v147_v17 }
  0x1d   :  { %332 = vmatpush3.msra.mxu1 %v147_v17 }
  0x1e   :  { %333 = vmatprep.subr.mxu1 %v146_v18 }
  0x1f   :  { %334 = vmatpush3.msra.mxu1 %v146_v18 }
  0x20   :  { %335 = vmatprep.subr.mxu1 %v145_v19 }
  0x21   :  { %336 = vmatpush3.msra.mxu1 %v145_v19 }
  0x22   :  { %337 = vmatprep.subr.mxu1 %v144_v20 }
  0x23   :  { %338 = vmatpush3.msra.mxu1 %v144_v20 }
  0x24   :  { %339 = vmatprep.subr.mxu1 %v143_v21 }
  0x25   :  { %340 = vmatpush3.msra.mxu1 %v143_v21 }
  0xca   :  { %v308_v24 = vpop.f32.mrf.mxu0 }
  0xcb   :  { %v122_v25 = vadd.f32 %v308_v24, %v270_v23 }
  0xcc   :  { %v116_v26 = vpop.f32.mrf.mxu0 }
  0xcd   :  { %v128_v27 = vmul.f32 %v122_v25, %v122_v25  ;;  %v117_v28 = vadd.f32 %v270_v23, %v116_v26  ;;  %v126_v43 = vmul.f32 0.5, %v122_v25 }
  0xcf   :  { %v130_v29 = vmul.f32 %v128_v27, %v122_v25  ;;  %v127_v30 = vmul.f32 %v117_v28, %v117_v28  ;;  %v125_v41 = vmul.f32 0.5, %v117_v28 }
  0xd1   :  { %v132_v31 = vmul.f32 0.044715, %v130_v29  ;;  %v129_v32 = vmul.f32 %v127_v30, %v117_v28 }
  0xd3   :  { %v134_v33 = vadd.f32 %v132_v31, %v122_v25  ;;  %v131_v34 = vmul.f32 0.044715, %v129_v32 }
  0xd5   :  { %v136_v35 = vmul.f32 0.7978846, %v134_v33  ;;  %v133_v36 = vadd.f32 %v131_v34, %v117_v28 }
  0xd7   :  { %v135_v37 = vmul.f32 0.7978846, %v133_v36  ;;  %348 = vtanh.f32 %v136_v35 }
  0xd9   :  { %350 = vtanh.f32 %v135_v37 }
  0xe4   :  { %v349_v38 = vpop.eup %348 }
  0xe5   :  { %v140_v40 = vadd.f32 1.0, %v349_v38 }
  0xe6   :  { %v351_v39 = vpop.eup %350 }
  0xe7   :  { %v139_v42 = vadd.f32 1.0, %v351_v39  ;;  %v142_v45 = vmul.f32 %v140_v40, %v126_v43 }
  0xe9   :  { %v141_v44 = vmul.f32 %v139_v42, %v125_v41 }
  0xeb   :  { %341 = vmatprep.mubr.f32.mxu1 %v141_v44 }
  0xec   :  { %342 = vmatmul.mubr.f32.vlgmr.msra.gmra.mxu1 %v142_v45 }
 0x1ac   :  { %v343_v47 = vpop.f32.mrf.mxu1 }
 0x1ad   :  { %v235_v49 = vadd.f32 %v343_v47, %v29_v46 }
 0x1ae   :  { %v225_v50 = vpop.f32.mrf.mxu1 }
 0x1af   :  { %237 = vst.msk [vmem:[#allocation2 + $0x8] sm:$0xff] %vm25_vm0, %v235_v49  ;;  %v234_v51 = vadd.f32 %v225_v50, %v28_v48 }
 0x1b1   :  { %236 = vst.msk [vmem:[#allocation2] sm:$0xff] %vm25_vm0, %v234_v51 }
 0x1b6   :  { %v242_v53 = vld [vmem:[#allocation2 + $0x8] sm:$0xff] }
 0x1b7   :  { %v251_v54 = vadd.f32 %v273_v52, %v242_v53 }
 0x1b8   :  { %v241_v55 = vld [vmem:[#allocation2] sm:$0xff] }
 0x1b9   :  { %v250_v56 = vadd.f32 %v273_v52, %v241_v55  ;;  %253 = vst.msk [vmem:[#allocation2 + $0x8] sm:$0xff] %vm25_vm0, %v251_v54 }
 0x1bb   :  { %252 = vst.msk [vmem:[#allocation2] sm:$0xff] %vm25_vm0, %v250_v56 }
 0x1bc   :  { %363 = shalt.err (!%p360_p4)
}
 0x1bd   :  { %s376_s13 = smov 128   ;;  %s377_s4 = smov 8  }
 0x1be   :  { %265 = dma.vmem_to_hbm [thread:$0]  %s260_s11, 256, %s496_s5, [#allocation3], %s376_s13, %s376_s13, %s377_s4  }
 0x1bf   :  { %372 = dma.done.wait [#allocation3], 256  }
 0x1c0   :  { %373 = vsyncadd [#allocation3], 4294967040 }
 0x1c1   :  { %269 = vsyncpa [#allocation3], 1 }

</bundles_post_ra>
